<compile_context>
chip_gen: v7x
topology: tpu7x:2x2x1
jax: 0.10.0
libtpu: 0.0.40
codegen_flags: <defaults>
</compile_context>

<pallas_src>
import functools

import numpy as np
import jax
import jax.numpy as jnp
from jax.experimental import pallas as pl
from jax.experimental.pallas import tpu as pltpu


def _round_up(x, m):
    return (x + m - 1) // m * m


def _pick_tile_n(Hp, Kp, wbytes, budget_bytes):
    """Largest tile_n (multiple of 128, dividing Hp) whose (Kp, 4*tile_n)
    weight block fits in `budget_bytes` (per buffer)."""
    best = 128
    for m in range(1, Hp // 128 + 1):
        tn = 128 * m
        if Hp % tn == 0 and Kp * 4 * tn * wbytes <= budget_bytes:
            best = tn
    return best


# --------------------------------------------------------------------------- #
# Fused multi-layer kernel: grid = (layer, hidden_chunk), both "arbitrary".
# --------------------------------------------------------------------------- #
def _fused_lstm_kernel(x_ref, h0_ref, c0_ref, w_ref, b_ref,
                       h1_ref, c1_ref, a_scr, hnxt_scr, *, in_slot, hp, tn):
    """x_ref:   (Bp, in_slot)      padded model input (layer 0 only)
       h0_ref:  (1, Bp, Hp)        this layer's previous hidden state (full)
       c0_ref:  (1, Bp, tn)        this layer's previous cell state (chunk j)
       w_ref:   (1, Kp, 4*tn)      [w_ih^T ; w_hh^T], chunk-major gate columns
       b_ref:   (1, 1, 4*tn)       b_ih + b_hh (f32), chunk-major gate columns
       h1_ref:  (1, Bp, tn)        new hidden state chunk (output)
       c1_ref:  (1, Bp, tn)        new cell state chunk (output)
       a_scr:   (Bp, Kp)           persistent combined [input | h] operand
       hnxt_scr:(Bp, Hp)           next layer's input, assembled chunk by chunk
    """
    l = pl.program_id(0)
    j = pl.program_id(1)

    # Layer 0 consumes the external input (once, at the first grid step).
    @pl.when((l == 0) & (j == 0))
    def _():
        a_scr[:, 0:in_slot] = x_ref[...].astype(a_scr.dtype)

    # Layers >= 1 consume the previous layer's hidden state (fully assembled
    # in hnxt_scr by the previous layer's chunks).
    @pl.when((l > 0) & (j == 0))
    def _():
        a_scr[:, 0:hp] = hnxt_scr[...]

    # Fresh h0 for this layer (once per layer).
    @pl.when(j == 0)
    def _():
        a_scr[:, in_slot:in_slot + hp] = h0_ref[0].astype(a_scr.dtype)

    # Single fused matmul on the MXU: [x | h] @ [w_ih^T ; w_hh^T] chunk.
    # Both operands are in the packed weight dtype (bf16 by default) ->
    # native bf16-in / f32-accumulate MXU path; no in-kernel weight upcast.
    gates = jnp.dot(a_scr[...], w_ref[0], preferred_element_type=jnp.float32)
    gates = gates + b_ref[0].astype(jnp.float32)

    # Gate order [i, f, g, o]; each slice is tn (multiple of 128) lanes wide,
    # so all slices / stores are unmasked and lane-dense.
    i_g = jax.nn.sigmoid(gates[:, 0 * tn:1 * tn])
    f_g = jax.nn.sigmoid(gates[:, 1 * tn:2 * tn])
    g_g = jnp.tanh(gates[:, 2 * tn:3 * tn])
    o_g = jax.nn.sigmoid(gates[:, 3 * tn:4 * tn])

    c_prev = c0_ref[0].astype(jnp.float32)
    c_new = f_g * c_prev + i_g * g_g
    h_new = o_g * jnp.tanh(c_new)

    h1_ref[0, :, :] = h_new.astype(h1_ref.dtype)
    c1_ref[0, :, :] = c_new.astype(c1_ref.dtype)

    # Stage this chunk of h for the next layer's input (do NOT write into the
    # live a_scr input slot: later chunks of this layer still read it).
    @pl.when(l + 1 < pl.num_programs(0))
    def _():
        hnxt_scr[:, pl.ds(pl.multiple_of(j * tn, tn), tn)] = (
            h_new.astype(hnxt_scr.dtype))


# --------------------------------------------------------------------------- #
# Parameter init (PyTorch nn.LSTMCell layout) and one-time packing.
# --------------------------------------------------------------------------- #
def init_multilayer_lstm_params(key, input_size, hidden_size, num_layers,
                                bias=True, dtype=jnp.float32):
    """PyTorch-style init: U(-1/sqrt(H), 1/sqrt(H)); PyTorch weight layout."""
    params = []
    bound = float(1.0 / (hidden_size ** 0.5))
    in_sz = input_size
    for _ in range(num_layers):
        key, k1, k2, k3, k4 = jax.random.split(key, 5)
        w_ih = jax.random.uniform(k1, (4 * hidden_size, in_sz), dtype, -bound, bound)
        w_hh = jax.random.uniform(k2, (4 * hidden_size, hidden_size), dtype, -bound, bound)
        if bias:
            b_ih = jax.random.uniform(k3, (4 * hidden_size,), dtype, -bound, bound)
            b_hh = jax.random.uniform(k4, (4 * hidden_size,), dtype, -bound, bound)
        else:
            b_ih = jnp.zeros((4 * hidden_size,), dtype)
            b_hh = jnp.zeros((4 * hidden_size,), dtype)
        params.append({"w_ih": w_ih, "w_hh": w_hh, "b_ih": b_ih, "b_hh": b_hh})
        in_sz = hidden_size
    return params


def pack_multilayer_lstm_params(params, input_size, hidden_size,
                                param_dtype=jnp.bfloat16, tile_n=None,
                                w_block_budget_bytes=4 << 20):
    """Stack + pad per-layer weights into the fused-kernel layout (done once).

    W:  (L, Kp, 4*Hp)  rows [0:in_l) = input weights, rows [in_slot:in_slot+H)
                       = hidden weights; columns are chunk-major:
                       for hidden chunk j, columns [j*4*tn:(j+1)*4*tn) hold
                       gates [i,f,g,o] (each tn wide) for hidden units
                       [j*tn:(j+1)*tn).
    b:  (L, 1, 4*Hp)   b_ih + b_hh summed in f32, same chunk-major order, f32.
    """
    L = len(params)
    H = hidden_size
    Hp = _round_up(H, 128)
    in_slot = _round_up(max(input_size, hidden_size), 128)
    # Kp is a multiple of 256 whenever in_slot == Hp (the common case), which
    # matches the 256-wide MXU on v6e/v7x.
    Kp = in_slot + Hp
    wbytes = jnp.dtype(param_dtype).itemsize
    if tile_n is None:
        tile_n = _pick_tile_n(Hp, Kp, wbytes, w_block_budget_bytes)
    assert Hp % tile_n == 0 and tile_n % 128 == 0
    n_chunks = Hp // tile_n

    Wg = np.zeros((L, Kp, 4, Hp), np.float32)
    bg = np.zeros((L, 4, Hp), np.float32)
    for l, p in enumerate(params):
        w_ih_t = np.asarray(p["w_ih"], np.float32).T          # (In_l, 4H)
        w_hh_t = np.asarray(p["w_hh"], np.float32).T          # (H,    4H)
        bias = np.asarray(p["b_ih"], np.float32) + np.asarray(p["b_hh"], np.float32)
        in_l = w_ih_t.shape[0]
        for g in range(4):
            Wg[l, 0:in_l, g, 0:H] = w_ih_t[:, g * H:(g + 1) * H]
            Wg[l, in_slot:in_slot + H, g, 0:H] = w_hh_t[:, g * H:(g + 1) * H]
            bg[l, g, 0:H] = bias[g * H:(g + 1) * H]

    # Reorder gate columns chunk-major: [chunk j][gate i,f,g,o][tile_n].
    W = (Wg.reshape(L, Kp, 4, n_chunks, tile_n)
           .transpose(0, 1, 3, 2, 4)
           .reshape(L, Kp, 4 * Hp))
    b = (bg.reshape(L, 4, n_chunks, tile_n)
           .transpose(0, 2, 1, 3)
           .reshape(L, 1, 4 * Hp))

    return {"W": jnp.asarray(W).astype(param_dtype),
            "b": jnp.asarray(b, jnp.float32),
            "H": H, "Hp": Hp, "in_slot": in_slot, "Kp": Kp,
            "tile_n": tile_n, "n_chunks": n_chunks,
            "input_size": input_size, "num_layers": L}


# --------------------------------------------------------------------------- #
# Forward wrapper (matches MultilayerLSTM.forward semantics).
# --------------------------------------------------------------------------- #
def multilayer_lstm_forward(packed, x, hidden_state):
    """x: (B, input_size); hidden_state = (h0, c0), each (L, B, H).
    Returns (out, (h1, c1)) with out == last layer's h."""
    h0, c0 = hidden_state
    L = packed["num_layers"]
    H, Hp, in_slot, Kp = packed["H"], packed["Hp"], packed["in_slot"], packed["Kp"]
    tn, n_chunks = packed["tile_n"], packed["n_chunks"]
    pdt = packed["W"].dtype
    B, in_sz = x.shape
    Bp = _round_up(max(B, 8), 8)

    # Tile-aligned zero padding keeps the gate math exact for the real rows.
    x_p = jnp.zeros((Bp, in_slot), x.dtype).at[:B, :in_sz].set(x)
    h0_p = jnp.zeros((L, Bp, Hp), x.dtype).at[:, :B, :H].set(h0.astype(x.dtype))
    c0_p = jnp.zeros((L, Bp, Hp), x.dtype).at[:, :B, :H].set(c0.astype(x.dtype))

    kernel = functools.partial(_fused_lstm_kernel, in_slot=in_slot, hp=Hp, tn=tn)

    abytes = jnp.dtype(x.dtype).itemsize
    wbytes = jnp.dtype(pdt).itemsize
    vmem_need = (2 * Kp * 4 * tn * wbytes          # W blocks (double-buffered)
                 + 2 * 8 * 4 * tn * 4              # bias blocks (sublane pad 1->8)
                 + 2 * Bp * in_slot * abytes       # x (resident)
                 + 2 * Bp * Hp * abytes            # h0
                 + 2 * Bp * tn * abytes            # c0
                 + 4 * Bp * tn * abytes            # h1, c1
                 + Bp * Kp * wbytes                # a_scr
                 + Bp * Hp * wbytes)               # hnxt_scr
    vmem_limit = int(min(112 << 20, vmem_need + (16 << 20)))

    w_bytes = int(packed["W"].size * wbytes + packed["b"].size * 4)
    act_bytes = int((x_p.size + 3 * L * Bp * Hp) * abytes + 2 * L * Bp * Hp * abytes)
    cost = pl.CostEstimate(flops=2 * L * Bp * Kp * 4 * Hp,
                           transcendentals=5 * L * Bp * Hp,
                           bytes_accessed=w_bytes + act_bytes)

    h1_p, c1_p = pl.pallas_call(
        kernel,
        out_shape=(jax.ShapeDtypeStruct((L, Bp, Hp), x.dtype),
                   jax.ShapeDtypeStruct((L, Bp, Hp), x.dtype)),
        grid_spec=pltpu.PrefetchScalarGridSpec(
            num_scalar_prefetch=0,
            grid=(L, n_chunks),
            in_specs=[
                pl.BlockSpec((Bp, in_slot), lambda l, j: (0, 0)),         # x (resident)
                pl.BlockSpec((1, Bp, Hp), lambda l, j: (l, 0, 0)),        # h0[l] (full)
                pl.BlockSpec((1, Bp, tn), lambda l, j: (l, 0, j)),        # c0[l] chunk j
                pl.BlockSpec((1, Kp, 4 * tn), lambda l, j: (l, 0, j)),    # W[l] chunk j
                pl.BlockSpec((1, 1, 4 * tn), lambda l, j: (l, 0, j)),     # b[l] chunk j
            ],
            out_specs=(
                pl.BlockSpec((1, Bp, tn), lambda l, j: (l, 0, j)),        # h1 chunk
                pl.BlockSpec((1, Bp, tn), lambda l, j: (l, 0, j)),        # c1 chunk
            ),
            scratch_shapes=[pltpu.VMEM((Bp, Kp), pdt),    # carried [x|h] operand
                            pltpu.VMEM((Bp, Hp), pdt)],   # next layer's input
        ),
        compiler_params=pltpu.CompilerParams(
            dimension_semantics=("arbitrary", "arbitrary"),
            vmem_limit_bytes=vmem_limit),
        cost_estimate=cost,
    )(x_p, h0_p, c0_p, packed["W"], packed["b"])

    h1 = h1_p[:, :B, :H].astype(h0.dtype)
    c1 = c1_p[:, :B, :H].astype(c0.dtype)
    out = h1[-1]
    return out, (h1, c1)


# --------------------------------------------------------------------------- #
# Pure-JAX reference for sanity checking (f32, highest matmul precision).
# --------------------------------------------------------------------------- #
def _reference_forward(params, x, hidden_state):
    h0, c0 = hidden_state
    hi = jax.lax.Precision.HIGHEST
    inp = x
    h1, c1 = [], []
    for i, p in enumerate(params):
        H = p["w_hh"].shape[1]
        gates = (jnp.dot(inp, p["w_ih"].T, precision=hi)
                 + jnp.dot(h0[i], p["w_hh"].T, precision=hi)
                 + p["b_ih"] + p["b_hh"])
        i_g = jax.nn.sigmoid(gates[:, :H])
        f_g = jax.nn.sigmoid(gates[:, H:2 * H])
        g_g = jnp.tanh(gates[:, 2 * H:3 * H])
        o_g = jax.nn.sigmoid(gates[:, 3 * H:])
        c_new = f_g * c0[i] + i_g * g_g
        h_new = o_g * jnp.tanh(c_new)
        inp = h_new
        h1.append(h_new)
        c1.append(c_new)
    return inp, (jnp.stack(h1), jnp.stack(c1))


def _run_case(key, batch, input_size, hidden_size, num_layers,
              param_dtype, tile_n, atol, rtol):
    key, kx, kh, kc, kp = jax.random.split(key, 5)
    params = init_multilayer_lstm_params(kp, input_size, hidden_size, num_layers)
    packed = pack_multilayer_lstm_params(params, input_size, hidden_size,
                                         param_dtype=param_dtype, tile_n=tile_n)
    x = jax.random.normal(kx, (batch, input_size), jnp.float32)
    h0 = jax.random.normal(kh, (num_layers, batch, hidden_size), jnp.float32)
    c0 = jax.random.normal(kc, (num_layers, batch, hidden_size), jnp.float32)

    out, (h1, c1) = multilayer_lstm_forward(packed, x, (h0, c0))
    out = jax.block_until_ready(out)
    h1 = jax.block_until_ready(h1)
    c1 = jax.block_until_ready(c1)

    ref_out, (ref_h1, ref_c1) = _reference_forward(params, x, (h0, c0))
    assert out.shape == (batch, hidden_size)
    assert h1.shape == (num_layers, batch, hidden_size)
    assert c1.shape == (num_layers, batch, hidden_size)
    assert jnp.allclose(out, ref_out, atol=atol, rtol=rtol)
    assert jnp.allclose(h1, ref_h1, atol=atol, rtol=rtol)
    assert jnp.allclose(c1, ref_c1, atol=atol, rtol=rtol)


if __name__ == "__main__":
    key = jax.random.PRNGKey(0)
    k1, k2, k3 = jax.random.split(key, 3)

    # 1) Small config, f32 weights (exact path), tight tolerance.
    _run_case(k1, batch=2, input_size=16, hidden_size=32, num_layers=2,
              param_dtype=jnp.float32, tile_n=None, atol=5e-3, rtol=5e-3)

    # 2) Same config, default bf16 weight path (HBM-bandwidth lever).
    _run_case(k2, batch=2, input_size=16, hidden_size=32, num_layers=2,
              param_dtype=jnp.bfloat16, tile_n=None, atol=7e-2, rtol=7e-2)

    # 3) Unaligned sizes + forced tile_n=128 to exercise the multi-chunk
    #    (gate-dimension-tiled) path: n_chunks = 2.
    _run_case(k3, batch=3, input_size=72, hidden_size=200, num_layers=3,
              param_dtype=jnp.bfloat16, tile_n=128, atol=7e-2, rtol=7e-2)

    print("KERNEL_OK")
</pallas_src>

<mosaic_0001>
module attributes {stable_mosaic.version = 11 : i64} {
  func.func @_fused_lstm_kernel(%arg0: i32, %arg1: i32, %arg2: memref<8x128xf32, #tpu.memory_space<vmem>>, %arg3: memref<1x8x128xf32, #tpu.memory_space<vmem>>, %arg4: memref<1x8x128xf32, #tpu.memory_space<vmem>>, %arg5: memref<1x256x512xf32, #tpu.memory_space<vmem>>, %arg6: memref<1x1x512xf32, #tpu.memory_space<vmem>>, %arg7: memref<1x8x128xf32, #tpu.memory_space<vmem>>, %arg8: memref<1x8x128xf32, #tpu.memory_space<vmem>>, %arg9: memref<8x256xf32, #tpu.memory_space<vmem>>, %arg10: memref<8x128xf32, #tpu.memory_space<vmem>>) attributes {dimension_semantics = [#tpu.dimension_semantics<arbitrary>, #tpu.dimension_semantics<arbitrary>], iteration_bounds = array<i64: 2, 1>, scalar_prefetch = 0 : i64, scratch_operands = 2 : i64, tpu.core_type = #tpu.core_type<tc>, window_params = [{pipeline_mode = #tpu.pipeline_mode<synchronous>, transform_indices = @transform_0, window_bounds = array<i64: 8, 128>}, {transform_indices = @transform_1, window_bounds = array<i64: 1, 8, 128>}, {transform_indices = @transform_2, window_bounds = array<i64: 1, 8, 128>}, {transform_indices = @transform_3, window_bounds = array<i64: 1, 256, 512>}, {transform_indices = @transform_4, window_bounds = array<i64: 1, 1, 512>}, {transform_indices = @transform_5, window_bounds = array<i64: 1, 8, 128>}, {transform_indices = @transform_6, window_bounds = array<i64: 1, 8, 128>}]} {
    %c0_i32 = arith.constant 0 : i32
    %0 = arith.cmpi eq, %arg0, %c0_i32 : i32
    %c0_i32_0 = arith.constant 0 : i32
    %1 = arith.cmpi eq, %arg1, %c0_i32_0 : i32
    %2 = arith.andi %0, %1 : i1
    %3 = arith.extui %2 : i1 to i32
    %c0_i32_1 = arith.constant 0 : i32
    %4 = arith.cmpi ne, %3, %c0_i32_1 : i32
    scf.if %4 {
      %c0_27 = arith.constant 0 : index
      %c0_28 = arith.constant 0 : index
      %58 = vector.load %arg2[%c0_27, %c0_28] : memref<8x128xf32, #tpu.memory_space<vmem>>, vector<8x128xf32>
      %c0_29 = arith.constant 0 : index
      %c0_30 = arith.constant 0 : index
      %59 = vector.load %arg9[%c0_29, %c0_30] : memref<8x256xf32, #tpu.memory_space<vmem>>, vector<8x128xf32>
      tpu.vector_store %arg9[%c0_29, %c0_30], %58 {strides = array<i32>} : memref<8x256xf32, #tpu.memory_space<vmem>>, vector<8x128xf32>,
    } else {
    }
    %c0_i32_2 = arith.constant 0 : i32
    %5 = arith.cmpi sgt, %arg0, %c0_i32_2 : i32
    %c0_i32_3 = arith.constant 0 : i32
    %6 = arith.cmpi eq, %arg1, %c0_i32_3 : i32
    %7 = arith.andi %5, %6 : i1
    %8 = arith.extui %7 : i1 to i32
    %c0_i32_4 = arith.constant 0 : i32
    %9 = arith.cmpi ne, %8, %c0_i32_4 : i32
    scf.if %9 {
      %c0_27 = arith.constant 0 : index
      %c0_28 = arith.constant 0 : index
      %58 = vector.load %arg10[%c0_27, %c0_28] : memref<8x128xf32, #tpu.memory_space<vmem>>, vector<8x128xf32>
      %c0_29 = arith.constant 0 : index
      %c0_30 = arith.constant 0 : index
      %59 = vector.load %arg9[%c0_29, %c0_30] : memref<8x256xf32, #tpu.memory_space<vmem>>, vector<8x128xf32>
      tpu.vector_store %arg9[%c0_29, %c0_30], %58 {strides = array<i32>} : memref<8x256xf32, #tpu.memory_space<vmem>>, vector<8x128xf32>,
    } else {
    }
    %c0_i32_5 = arith.constant 0 : i32
    %10 = arith.cmpi eq, %arg1, %c0_i32_5 : i32
    %11 = arith.extui %10 : i1 to i32
    %c0_i32_6 = arith.constant 0 : i32
    %12 = arith.cmpi ne, %11, %c0_i32_6 : i32
    scf.if %12 {
      %c0_27 = arith.constant 0 : index
      %c0_28 = arith.constant 0 : index
      %c0_29 = arith.constant 0 : index
      %58 = vector.load %arg3[%c0_27, %c0_28, %c0_29] : memref<1x8x128xf32, #tpu.memory_space<vmem>>, vector<1x8x128xf32>
      %59 = vector.shape_cast %58 : vector<1x8x128xf32> to vector<8x128xf32>
      %c0_30 = arith.constant 0 : index
      %c128 = arith.constant 128 : index
      %60 = vector.load %arg9[%c0_30, %c128] : memref<8x256xf32, #tpu.memory_space<vmem>>, vector<8x128xf32>
      tpu.vector_store %arg9[%c0_30, %c128], %59 {strides = array<i32>} : memref<8x256xf32, #tpu.memory_space<vmem>>, vector<8x128xf32>,
    } else {
    }
    %c0 = arith.constant 0 : index
    %c0_7 = arith.constant 0 : index
    %13 = vector.load %arg9[%c0, %c0_7] : memref<8x256xf32, #tpu.memory_space<vmem>>, vector<8x256xf32>
    %c0_8 = arith.constant 0 : index
    %c0_9 = arith.constant 0 : index
    %c0_10 = arith.constant 0 : index
    %14 = vector.load %arg5[%c0_8, %c0_9, %c0_10] : memref<1x256x512xf32, #tpu.memory_space<vmem>>, vector<1x256x512xf32>
    %15 = vector.shape_cast %14 : vector<1x256x512xf32> to vector<256x512xf32>
    %cst = arith.constant dense<0.000000e+00> : vector<8x512xf32>
    %16 = tpu.matmul %13, %15, %cst {dimension_numbers = #tpu.dot_dimension_numbers<[1], [0], [0], [1], [0, 0, 1, 1], [], []>} : vector<8x256xf32>, vector<256x512xf32>, vector<8x512xf32> -> vector<8x512xf32>
    %c0_11 = arith.constant 0 : index
    %c0_12 = arith.constant 0 : index
    %c0_13 = arith.constant 0 : index
    %17 = vector.load %arg6[%c0_11, %c0_12, %c0_13] : memref<1x1x512xf32, #tpu.memory_space<vmem>>, vector<1x1x512xf32>
    %18 = vector.shape_cast %17 : vector<1x1x512xf32> to vector<1x512xf32>
    %19 = vector.broadcast %18 : vector<1x512xf32> to vector<8x512xf32>
    %20 = arith.addf %16, %19 : vector<8x512xf32>
    %21 = vector.extract_strided_slice %20 {offsets = [0, 0], sizes = [8, 128], strides = [1, 1]} : vector<8x512xf32> to vector<8x128xf32>
    %22 = arith.negf %21 : vector<8x128xf32>
    %23 = math.exp %22 : vector<8x128xf32>
    %cst_14 = arith.constant 1.000000e+00 : f32
    %24 = vector.broadcast %cst_14 : f32 to vector<8x128xf32>
    %25 = arith.addf %24, %23 : vector<8x128xf32>
    %26 = arith.divf %24, %25 : vector<8x128xf32>
    %27 = vector.extract_strided_slice %20 {offsets = [0, 128], sizes = [8, 128], strides = [1, 1]} : vector<8x512xf32> to vector<8x128xf32>
    %28 = arith.negf %27 : vector<8x128xf32>
    %29 = math.exp %28 : vector<8x128xf32>
    %cst_15 = arith.constant 1.000000e+00 : f32
    %30 = vector.broadcast %cst_15 : f32 to vector<8x128xf32>
    %31 = arith.addf %30, %29 : vector<8x128xf32>
    %32 = arith.divf %30, %31 : vector<8x128xf32>
    %33 = vector.extract_strided_slice %20 {offsets = [0, 256], sizes = [8, 128], strides = [1, 1]} : vector<8x512xf32> to vector<8x128xf32>
    %34 = math.tanh %33 : vector<8x128xf32>
    %35 = vector.extract_strided_slice %20 {offsets = [0, 384], sizes = [8, 128], strides = [1, 1]} : vector<8x512xf32> to vector<8x128xf32>
    %36 = arith.negf %35 : vector<8x128xf32>
    %37 = math.exp %36 : vector<8x128xf32>
    %cst_16 = arith.constant 1.000000e+00 : f32
    %38 = vector.broadcast %cst_16 : f32 to vector<8x128xf32>
    %39 = arith.addf %38, %37 : vector<8x128xf32>
    %40 = arith.divf %38, %39 : vector<8x128xf32>
    %c0_17 = arith.constant 0 : index
    %c0_18 = arith.constant 0 : index
    %c0_19 = arith.constant 0 : index
    %41 = vector.load %arg4[%c0_17, %c0_18, %c0_19] : memref<1x8x128xf32, #tpu.memory_space<vmem>>, vector<1x8x128xf32>
    %42 = vector.shape_cast %41 : vector<1x8x128xf32> to vector<8x128xf32>
    %43 = arith.mulf %32, %42 : vector<8x128xf32>
    %44 = arith.mulf %26, %34 : vector<8x128xf32>
    %45 = arith.addf %43, %44 : vector<8x128xf32>
    %46 = math.tanh %45 : vector<8x128xf32>
    %47 = arith.mulf %40, %46 : vector<8x128xf32>
    %c0_20 = arith.constant 0 : index
    %c0_21 = arith.constant 0 : index
    %c0_22 = arith.constant 0 : index
    %48 = vector.load %arg7[%c0_20, %c0_21, %c0_22] : memref<1x8x128xf32, #tpu.memory_space<vmem>>, vector<1x8x128xf32>
    %49 = vector.shape_cast %48 : vector<1x8x128xf32> to vector<8x128xf32>
    %50 = vector.shape_cast %47 : vector<8x128xf32> to vector<1x8x128xf32>
    tpu.vector_store %arg7[%c0_20, %c0_21, %c0_22], %50 {strides = array<i32>} : memref<1x8x128xf32, #tpu.memory_space<vmem>>, vector<1x8x128xf32>,
    %c0_23 = arith.constant 0 : index
    %c0_24 = arith.constant 0 : index
    %c0_25 = arith.constant 0 : index
    %51 = vector.load %arg8[%c0_23, %c0_24, %c0_25] : memref<1x8x128xf32, #tpu.memory_space<vmem>>, vector<1x8x128xf32>
    %52 = vector.shape_cast %51 : vector<1x8x128xf32> to vector<8x128xf32>
    %53 = vector.shape_cast %45 : vector<8x128xf32> to vector<1x8x128xf32>
    tpu.vector_store %arg8[%c0_23, %c0_24, %c0_25], %53 {strides = array<i32>} : memref<1x8x128xf32, #tpu.memory_space<vmem>>, vector<1x8x128xf32>,
    %c1_i32 = arith.constant 1 : i32
    %54 = arith.addi %arg0, %c1_i32 : i32
    %c2_i32 = arith.constant 2 : i32
    %55 = arith.cmpi slt, %54, %c2_i32 : i32
    %56 = arith.extui %55 : i1 to i32
    %c0_i32_26 = arith.constant 0 : i32
    %57 = arith.cmpi ne, %56, %c0_i32_26 : i32
    scf.if %57 {
      %c128_i32 = arith.constant 128 : i32
      %58 = arith.muli %arg1, %c128_i32 : i32
      %59 = tpu.assume_multiple %58, 128 : i32
      %c0_27 = arith.constant 0 : index
      %60 = arith.index_cast %59 : i32 to index
      %61 = vector.load %arg10[%c0_27, %60] : memref<8x128xf32, #tpu.memory_space<vmem>>, vector<8x128xf32>
      tpu.vector_store %arg10[%c0_27, %60], %47 {strides = array<i32>} : memref<8x128xf32, #tpu.memory_space<vmem>>, vector<8x128xf32>,
    } else {
    }
    return
  }
  func.func @transform_0(%arg0: i32, %arg1: i32) -> (i32, i32) {
    %c0_i32 = arith.constant 0 : i32
    %c0_i32_0 = arith.constant 0 : i32
    %c0_i32_1 = arith.constant 0 : i32
    return %c0_i32, %c0_i32_0 : i32, i32
  }
  func.func @transform_1(%arg0: i32, %arg1: i32) -> (i32, i32, i32) {
    %c0_i32 = arith.constant 0 : i32
    %c0_i32_0 = arith.constant 0 : i32
    %c0_i32_1 = arith.constant 0 : i32
    return %arg0, %c0_i32, %c0_i32_0 : i32, i32, i32
  }
  func.func @transform_2(%arg0: i32, %arg1: i32) -> (i32, i32, i32) {
    %c0_i32 = arith.constant 0 : i32
    %c0_i32_0 = arith.constant 0 : i32
    return %arg0, %c0_i32, %arg1 : i32, i32, i32
  }
  func.func @transform_3(%arg0: i32, %arg1: i32) -> (i32, i32, i32) {
    %c0_i32 = arith.constant 0 : i32
    %c0_i32_0 = arith.constant 0 : i32
    return %arg0, %c0_i32, %arg1 : i32, i32, i32
  }
  func.func @transform_4(%arg0: i32, %arg1: i32) -> (i32, i32, i32) {
    %c0_i32 = arith.constant 0 : i32
    %c0_i32_0 = arith.constant 0 : i32
    return %arg0, %c0_i32, %arg1 : i32, i32, i32
  }
  func.func @transform_5(%arg0: i32, %arg1: i32) -> (i32, i32, i32) {
    %c0_i32 = arith.constant 0 : i32
    %c0_i32_0 = arith.constant 0 : i32
    return %arg0, %c0_i32, %arg1 : i32, i32, i32
  }
  func.func @transform_6(%arg0: i32, %arg1: i32) -> (i32, i32, i32) {
    %c0_i32 = arith.constant 0 : i32
    %c0_i32_0 = arith.constant 0 : i32
    return %arg0, %c0_i32, %arg1 : i32, i32, i32
  }
}

</mosaic_0001>

<bundles_post_ra>
// kernel: tpu_custom_call.1
= control target key start
LH: loop header
LB: loop body
LE: loop exit
PB: predicated region body
PF: predicated region fallthrough
CT: control target
= control target key end

     0   :  { %s2027_s0 = inlined_call_operand.hbm [shape: f32[8,128], index: 0, kind: input, shape index: {}]   ;;  %s2028_s1 = inlined_call_operand.hbm [shape: f32[2,8,128], index: 1, kind: input, shape index: {}]   ;;  %s2029_s2 = inlined_call_operand.hbm [shape: f32[2,8,128], index: 2, kind: input, shape index: {}]   ;;  %s2030_s3 = inlined_call_operand.hbm [shape: f32[2,256,512], index: 3, kind: input, shape index: {}]   ;;  %s2031_s4 = inlined_call_operand.vmem [shape: f32[2,1,512], index: 4, kind: input, shape index: {}]   ;;  %s2032_s5 = inlined_call_operand.hbm [shape: f32[2,8,128], index: 5, kind: output, shape index: {0}]   ;;  %s2033_s6 = inlined_call_operand.hbm [shape: f32[2,8,128], index: 6, kind: output, shape index: {1}]  }
   0x1   :  { %2048 = sst [smem:[#allocation24_spill]] %s2028_s1 }
   0x2   :  { %12 = vsyncpa [#allocation5], 0 }
   0x3   :  { %13 = vsyncpa [#allocation8], 0 }
   0x4   :  { %15 = vsyncpa [#allocation8 + $0x1], 0 }
   0x5   :  { %16 = vsyncpa [#allocation11], 0 }
   0x6   :  { %18 = vsyncpa [#allocation11 + $0x1], 0 }
   0x7   :  { %19 = vsyncpa [#allocation6], 0 }
   0x8   :  { %21 = vsyncpa [#allocation6 + $0x1], 0 }
   0x9   :  { %22 = vsyncpa [#allocation14], 0 }
   0xa   :  { %24 = vsyncpa [#allocation14 + $0x1], 0  ;;  %s1548_s21 = smov 0   ;;  %s1550_s22 = smov 0  }
   0xb   :  { %s1552_s23 = smov 0   ;;  %s1554_s24 = smov 0  }
   0xc   :  { %s1556_s25 = smov 0   ;;  %s1558_s26 = smov 0  }
   0xd LB: > { %2049 = sst [smem:[#allocation20_spill]] %s1491_s23  ;;  %s42_s27 = sadd.s32 1, %s1499_s25  ;;  %s1503_s26 = sphi %s1558_s26, %s30_s26   ;;  %s1499_s25 = sphi %s1556_s25, %s2082_s25   ;;  %s1495_s24 = sphi %s1554_s24, %s2081_s24   ;;  %s1491_s23 = sphi %s1552_s23, %s2077_s23   ;;  %s1487_s22 = sphi %s1550_s22, %s2080_s22   ;;  %s1483_s21 = sphi %s1548_s21, %s2079_s21  }
   0xe   : > { %2050 = sst [smem:[#allocation21_spill]] %s1503_s26  ;;  %s70_s28 = sadd.s32 1, %s1491_s23 }
   0xf   : > { %p44_p0 = scmp.ge.s32.totalorder %s42_s27, 2  ;;  %p2034_p1 = scmp.ne.s32.totalorder %s1491_s23, %s1487_s22 }
  0x10   : > { %p78_p2 = scmp.eq.s32.totalorder %s1503_s26, 0  ;;  %p1193_p5 = scmp.lt.s32.totalorder %s1503_s26, 2 }
  0x11   : > { %s2084_s27 = smov (%p44_p0, %s42_s27), 0  ;;  %s258_s30 = sand.u32 1, %s1503_s26  }
  0x12   : > { %2051 = sst [smem:[#allocation22_spill]] %s2084_s27  ;;  %p79_p4 = por %p78_p2, %p2034_p1 }
  0x13   : > { %s67_s29 = ssub.s32 %s1499_s25, %s2084_s27  ;;  %s1594_s7 = sand.u32 1, %s1491_s23  }
  0x14   : > { %p68_p6 = scmp.eq.s32.totalorder %s67_s29, 0  ;;  %s1000_s8 = sshll.u32 %s1499_s25, 7 }
  0x15   : > { %s999_s10 = sshll.u32 %s1594_s7, 3  ;;  %s2053_s1 = sld [smem:[#allocation24_spill]] }
  0x16   : > { %s1598_s9 = scalar_select %p68_p6, %s1491_s23, %s70_s28  }
  0x17   : > { %p1608_p7 = pnand %p1193_p5, %p79_p4  ;;  %s262_s15 = scalar_lea.vmem [#allocation7], %s999_s10 }
  0x18   : > { %2052 = sst [smem:[#allocation23_spill]] %s1598_s9  ;;  %s269_s16 = sshll.u32 %s262_s15, 4  ;;  %s1614_s16 = int_to_ptr.vmem [resolvable:$true] %s269_s16 }
  0x19   : > { %s2054_s14 = scalar_select %p1608_p7, 1, 0 }
  0x1a   : > { %s1616_s17 = scalar_lea.sflag [#allocation8], %s258_s30  ;;  %p1622_p9 = pneg %p1608_p7 }
  0x1b   : > { %s1606_s13 = scalar_lea.hbm %s2053_s1, %s1000_s8  ;;  %s1268_s29 = scalar_lea.hbm %s2053_s1, 256 }
  0x1c   : > { %s1263_s18 = scalar_lea.hbm %s1606_s13, 128  ;;  %p1269_p12 = scmp.lt.u32.totalorder %s1606_s13, %s2053_s1 }
  0x1d   : > { %p1264_p8 = scmp.ne.s32.totalorder %s1606_s13, %s1263_s18  ;;  %p1270_p13 = scmp.lt.u32.totalorder %s1268_s29, %s1263_s18 }
  0x1e   : > { %s2055_s19 = scalar_select %p1622_p9, 1, 0 }
  0x1f   : > { %p1266_p10 = pnand %p1622_p9, %p1264_p8  ;;  %p1271_p0 = por %p1270_p13, %p1269_p12 }
  0x20   : > { %p1272_p2 = scmp.lt.u32.totalorder %s1263_s18, %s1606_s13 }
  0x21   : > { %p1267_p11 = pneg %p1266_p10 }
  0x22   : > { %p1273_p4 = por %p1272_p2, %p1271_p0 }
  0x24   : > { %p1274_p5 = pnand %p1273_p4, %p1267_p11 }
  0x26   : > { %1277 = shalt.err (!%p1274_p5)
}
  0x27   : > { %s1278_s30 = scalar_lea.vmem %s1614_s16, 128  ;;  %s1505_s15 = smov [#allocation7]  }
  0x28   : > { %p1279_p6 = scmp.ne.s32.totalorder %s1614_s16, %s1278_s30  ;;  %s1283_s20 = sshll.u32 %s1505_s15, 4  ;;  %s1284_s20 = int_to_ptr.vmem [resolvable:$false] %s1283_s20 }
  0x29   : > { %s1285_s28 = scalar_lea.vmem %s1284_s20, 256  ;;  %p1286_p3 = scmp.lt.s32.totalorder %s1614_s16, %s1284_s20 }
  0x2a   : > { %p1281_p8 = pnand %p1279_p6, %p1622_p9  ;;  %p1287_p1 = scmp.lt.s32.totalorder %s1285_s28, %s1278_s30 }
  0x2c   : > { %p1282_p10 = pneg %p1281_p8  ;;  %p1288_p12 = por %p1287_p1, %p1286_p3 }
  0x2e   : > { %p1289_p13 = pnand %p1288_p12, %p1282_p10 }
  0x30   : > { %1292 = shalt.err (!%p1289_p13)
}
  0x31   : > { %1178 = dma.hbm_to_vmem [thread:$0]  (!%p1608_p7), %s1606_s13, 128, %s1614_s16, %s1616_s17  }
  0x32   : > { %s1651_s11 = scalar_lea.hbm %s2029_s2, %s1000_s8  ;;  %s1654_s12 = sadd.s32 4294967295, %s1503_s26  }
  0x33   : > { %s995_s30 = sadd.s32 4294967294, %s1503_s26   ;;  %p83_p1 = scmp.ne.s32.totalorder %s1487_s22, %s1483_s21 }
  0x34   : > { %p2039_p3 = scmp.eq.s32.totalorder %s1654_s12, 0  ;;  %p193_p11 = scmp.eq.s32.totalorder %s1654_s12, 1 }
  0x35   : > { %p199_p0 = scmp.eq.s32.totalorder %s995_s30, 1  ;;  %p996_p2 = scmp.ge.s32.totalorder %s1503_s26, 1 }
  0x36   : > { %p1664_p4 = por %p2039_p3, %p83_p1  ;;  %p2057_p5 = scmp.ne.s32.totalorder %s1491_s23, %s1487_s22 }
  0x37   : > { %p1675_p8 = por %p199_p0, %p83_p1  ;;  %p234_p10 = scmp.lt.s32.totalorder %s1503_s26, 3 }
  0x38   : > { %s2056_s13 = scalar_select %p1664_p4, 1, 0 }
  0x39   : > { %p1671_p6 = por %p193_p11, %p2057_p5  ;;  %p1680_p12 = pnand %p996_p2, %p234_p10 }
  0x3a   : > { %s2059_s16 = scalar_select %p1675_p8, 1, 0 }
  0x3b   : > { %s2058_s8 = scalar_select %p1671_p6, 1, 0 }
  0x3c   : > { %s2060_s15 = scalar_select %p1680_p12, 1, 0 }
  0x3d   : > { %s1506_s20 = smov [#allocation4]   ;;  %s280_s18 = scalar_lea.vmem [#allocation9], %s999_s10 }
  0x3e   : > { %s247_s28 = sshll.u32 %s1506_s20, 4  ;;  %s288_s29 = sshll.u32 %s280_s18, 4  ;;  %s1684_s28 = int_to_ptr.vmem [resolvable:$true] %s247_s28  ;;  %s289_s29 = int_to_ptr.vmem [resolvable:$true] %s288_s29 }
  0x3f   : > { %s1293_s30 = scalar_lea.hbm %s1651_s11, 128  ;;  %s1298_s9 = scalar_lea.hbm %s2029_s2, 256 }
  0x40   : > { %p1294_p1 = scmp.ne.s32.totalorder %s1651_s11, %s1293_s30  ;;  %p1299_p2 = scmp.lt.u32.totalorder %s1651_s11, %s2029_s2 }
  0x41   : > { %p1300_p5 = scmp.lt.u32.totalorder %s1298_s9, %s1293_s30  ;;  %p1302_p3 = scmp.lt.u32.totalorder %s1293_s30, %s1651_s11 }
  0x42   : > { %p1296_p11 = pnand %p1294_p1, %p1622_p9 }
  0x43   : > { %p1301_p10 = por %p1300_p5, %p1299_p2 }
  0x44   : > { %p1297_p0 = pneg %p1296_p11 }
  0x45   : > { %p1303_p8 = por %p1302_p3, %p1301_p10 }
  0x47   : > { %p1304_p6 = pnand %p1303_p8, %p1297_p0 }
  0x49   : > { %1307 = shalt.err (!%p1304_p6)
}
  0x4a   : > { %s1308_s10 = scalar_lea.vmem %s289_s29, 128  ;;  %s1507_s20 = smov [#allocation9]  }
  0x4b   : > { %p1309_p13 = scmp.ne.s32.totalorder %s289_s29, %s1308_s10  ;;  %s1313_s18 = sshll.u32 %s1507_s20, 4  ;;  %s1314_s18 = int_to_ptr.vmem [resolvable:$false] %s1313_s18 }
  0x4c   : > { %s1315_s1 = scalar_lea.vmem %s1314_s18, 256  ;;  %p1316_p4 = scmp.lt.s32.totalorder %s289_s29, %s1314_s18 }
  0x4d   : > { %p1311_p1 = pnand %p1309_p13, %p1622_p9  ;;  %p1317_p12 = scmp.lt.s32.totalorder %s1315_s1, %s1308_s10 }
  0x4f   : > { %p1312_p11 = pneg %p1311_p1  ;;  %p1318_p7 = por %p1317_p12, %p1316_p4 }
  0x51   : > { %p1319_p2 = pnand %p1318_p7, %p1312_p11 }
  0x53   : > { %1322 = shalt.err (!%p1319_p2)
}
  0x54   : > { %p2061_p5 = scmp.ne.s32.totalorder %s2054_s14, 0  ;;  %p2062_p3 = scmp.eq.s32.totalorder %s1654_s12, 0 }
  0x55   : > { %p2063_p6 = scmp.ne.s32.totalorder %s2060_s15, 0  ;;  %s1003_s26 = sshll.u32 %s1594_s7, 10 }
  0x56   : > { %1181 = dma.hbm_to_vmem [thread:$0]  (!%p2061_p5), %s1651_s11, 128, %s289_s29, %s1616_s17  }
  0x57   : > { %p2064_p8 = pneg %p2063_p6  ;;  %s1026_s27 = sshll.u32 %s1499_s25, 14 }
  0x58   : > { %s1323_s10 = scalar_lea.hbm %s2027_s0, 128 }
  0x59   : > { %p1713_p13 = pnand %p2064_p8, %p2062_p3  ;;  %p1324_p7 = scmp.ne.s32.totalorder %s2027_s0, %s1323_s10 }
  0x5a   : > { %p1330_p10 = scmp.lt.u32.totalorder %s1323_s10, %s2027_s0 }
  0x5b   : > { %p1325_p4 = pneg %p1713_p13 }
  0x5d   : > { %p1326_p12 = pnand %p1325_p4, %p1324_p7 }
  0x5f   : > { %p1327_p0 = pneg %p1326_p12 }
  0x61   : > { %p1332_p1 = pnand %p1330_p10, %p1327_p0 }
  0x63   : > { %1335 = shalt.err (!%p1332_p1)
}
  0x64   : > { %s1336_s29 = scalar_lea.vmem %s1684_s28, 128  ;;  %p1344_p8 = scmp.lt.s32.totalorder %s1684_s28, %s1684_s28 }
  0x65   : > { %p1337_p11 = scmp.ne.s32.totalorder %s1684_s28, %s1336_s29  ;;  %p1345_p6 = scmp.lt.s32.totalorder %s1336_s29, %s1336_s29 }
  0x67   : > { %p1339_p2 = pnand %p1337_p11, %p1325_p4  ;;  %p1346_p5 = por %p1345_p6, %p1344_p8 }
  0x69   : > { %p1340_p3 = pneg %p1339_p2 }
  0x6b   : > { %p1347_p9 = pnand %p1346_p5, %p1340_p3 }
  0x6d   : > { %1350 = shalt.err (!%p1347_p9)
}
  0x6e   : > { %1174 = dma.hbm_to_vmem [thread:$0]  (!%p1713_p13), %s2027_s0, 128, %s1684_s28, [#allocation5]  }
  0x6f   : > { %s1743_s20 = scalar_lea.hbm %s2030_s3, %s1026_s27  ;;  %s299_s18 = scalar_lea.vmem [#allocation10], %s1003_s26 }
  0x70   : > { %s308_s17 = sshll.u32 %s299_s18, 4  ;;  %s296_s23 = scalar_lea.sflag [#allocation11], %s1594_s7  ;;  %s1745_s17 = int_to_ptr.vmem [resolvable:$true] %s308_s17 }
  0x71   : > { %s1351_s11 = scalar_lea.hbm %s1743_s20, 16384  ;;  %p2066_p5 = scmp.ne.s32.totalorder %s2055_s19, 0 }
  0x72   : > { %p1352_p9 = scmp.ne.s32.totalorder %s1743_s20, %s1351_s11  ;;  %s1356_s1 = scalar_lea.hbm %s2030_s3, 32768 }
  0x73   : > { %p1357_p13 = scmp.lt.u32.totalorder %s1743_s20, %s2030_s3  ;;  %p1358_p4 = scmp.lt.u32.totalorder %s1356_s1, %s1351_s11 }
  0x74   : > { %p1354_p6 = pnand %p1352_p9, %p2066_p5  ;;  %p1360_p0 = scmp.lt.u32.totalorder %s1351_s11, %s1743_s20 }
  0x75   : > { %p1359_p12 = por %p1358_p4, %p1357_p13 }
  0x76   : > { %p1355_p7 = pneg %p1354_p6 }
  0x77   : > { %p1361_p10 = por %p1360_p0, %p1359_p12 }
  0x79   : > { %p1362_p1 = pnand %p1361_p10, %p1355_p7 }
  0x7b   : > { %1365 = shalt.err (!%p1362_p1)
}
  0x7c   : > { %s1366_s26 = scalar_lea.vmem %s1745_s17, 16384  ;;  %s1508_s30 = smov [#allocation10]  }
  0x7d   : > { %p1367_p11 = scmp.ne.s32.totalorder %s1745_s17, %s1366_s26  ;;  %s1371_s10 = sshll.u32 %s1508_s30, 4  ;;  %s1372_s10 = int_to_ptr.vmem [resolvable:$false] %s1371_s10 }
  0x7e   : > { %s1373_s18 = scalar_lea.vmem %s1372_s10, 32768  ;;  %p1374_p8 = scmp.lt.s32.totalorder %s1745_s17, %s1372_s10 }
  0x7f   : > { %p1369_p2 = pnand %p1367_p11, %p2066_p5  ;;  %p1375_p9 = scmp.lt.s32.totalorder %s1373_s18, %s1366_s26 }
  0x81   : > { %p1370_p3 = pneg %p1369_p2  ;;  %p1376_p6 = por %p1375_p9, %p1374_p8 }
  0x83   : > { %p1377_p13 = pnand %p1376_p6, %p1370_p3 }
  0x85   : > { %1380 = shalt.err (!%p1377_p13)
}
  0x86   : > { %s1509_s11 = smov 512   ;;  %s1510_s28 = smov 32  }
  0x87   : > { %p2067_p7 = scmp.ne.s32.totalorder %s2054_s14, 0  ;;  %p2068_p5 = scmp.ne.s32.totalorder %s2060_s15, 0 }
  0x88   : > { %p2069_p4 = scmp.eq.s32.totalorder (!%p2068_p5), %s1654_s12, 0 }
  0x89   : > { %1184 = dma.hbm_to_vmem [thread:$0]  (!%p2067_p7), %s1743_s20, 16384, %s1745_s17, %s296_s23, %s1509_s11, %s1509_s11, %s1510_s28  }
  0x8a   : > { %332 = sbr.rel (%p2068_p5) target bundleno = 549 (0x225), region = 40 }
  0x91   : > { %1462 = dma.done.wait (%p2069_p4), [#allocation5], 128   ;;  %p2070_p12 = pmov %p2069_p4 }
  0x92   : > { %s338_s19 = sand.u32 1, %s1654_s12   ;;  %s1779_s29 = sand.u32 1, %s1487_s22  }
  0x93   : > { %1464 = vsyncadd (%p2070_p12), [#allocation5], 4294967168  ;;  %s1782_s1 = sshll.u32 %s1779_s29, 3  ;;  %s339_s7 = scalar_lea.sflag [#allocation8], %s338_s19 }
  0x94   : > { %s342_s14 = scalar_lea.vmem [#allocation7], %s1782_s1  ;;  %p2071_p0 = scmp.ne.s32.totalorder %s2056_s13, 0 }
  0x96   : > { %1466 = dma.done.wait (%p2071_p0), %s339_s7, 256  }
  0x97   : > { %1468 = vsyncadd (%p2071_p0), %s339_s7, 4294967040  ;;  %s1010_s15 = sshll.u32 %s1779_s29, 10  ;;  %s351_s20 = scalar_lea.vmem [#allocation9], %s1782_s1 }
  0x98   : > { %s357_s12 = scalar_lea.sflag [#allocation11], %s1779_s29  ;;  %s1792_s17 = scalar_lea.vmem [#allocation10], %s1010_s15 }
  0x99   : > { %1470 = dma.done.wait (%p2071_p0), %s357_s12, 16384  }
  0x9a   : > { %1472 = vsyncadd (%p2071_p0), %s357_s12, 4294950912  ;;  %p414_p10 = scmp.lt.s32.totalorder %s1495_s24, 1  ;;  %p422_p1 = scmp.eq.s32.totalorder %s1495_s24, 0 }
  0x9b   : > { %s404_s10 = scalar_lea.vmem [#allocation12], %s1782_s1  ;;  %s411_s18 = scalar_lea.vmem [#allocation13], %s1782_s1  ;;  %v428_v0 = vld [vmem:[#allocation4] sm:$0xff] (%p422_p1) }
  0x9c   : > { %s415_s23 = scalar_select %p414_p10, %s1495_s24, 1 }
  0x9d   : > { %427 = sbr.rel (!%p422_p1) target bundleno = 164 (0xa4), region = 60  ;;  %429 = vst [vmem:[#allocation2] sm:$0xff] (%p422_p1), %v428_v0 }
  0x9e   : > { %s1013_s27 = sshll.u32 %s415_s23, 2 }
  0x9f   : > { %s1804_s30 = scalar_lea.vmem %s2031_s4, %s1013_s27 }
  0xa4 PF: > { %p430_p11 = scmp.gt.s32.totalorder %s1495_s24, 0 }
  0xa5   : > { %v435_v1 = vld [vmem:[#allocation3] sm:$0xff] (%p430_p11) }
  0xa6   : > { %434 = sbr.rel (!%p430_p11) target bundleno = 173 (0xad), region = 64  ;;  %436 = vst [vmem:[#allocation2] sm:$0xff] (%p430_p11), %v435_v1 }
  0xad PF: > { %v445_v2 = vld [vmem:[%s1792_s17 + $0x8] sm:$0xff]  ;;  %v444_v4 = vld [vmem:[%s1792_s17] sm:$0xff]  ;;  %v447_v20 = vld [vmem:[%s1792_s17 + $0x18] sm:$0xff]  ;;  %s763_s13 = sadd.s32 1, %s1495_s24 }
  0xae   : > { %v449_v3 = vld [vmem:[%s1792_s17 + $0x28] sm:$0xff]  ;;  %v448_v6 = vld [vmem:[%s1792_s17 + $0x20] sm:$0xff]  ;;  %v451_v21 = vld [vmem:[%s1792_s17 + $0x38] sm:$0xff]  ;;  %p1019_p2 = scmp.ge.s32.totalorder %s763_s13, 2 }
  0xaf   : > { %v1029_v5 = vpack.c.bf16 %v449_v3, %v445_v2  ;;  %v453_v7 = vld [vmem:[%s1792_s17 + $0x48] sm:$0xff]  ;;  %v1031_v9 = vpack.c.bf16 %v448_v6, %v444_v4  ;;  %v452_v11 = vld [vmem:[%s1792_s17 + $0x40] sm:$0xff]  ;;  %v1093_v23 = vpack.c.bf16 %v451_v21, %v447_v20  ;;  %v446_v24 = vld [vmem:[%s1792_s17 + $0x10] sm:$0xff] }
  0xb0   : > { %v457_v8 = vld [vmem:[%s1792_s17 + $0x68] sm:$0xff]  ;;  %v456_v12 = vld [vmem:[%s1792_s17 + $0x60] sm:$0xff]  ;;  %v450_v25 = vld [vmem:[%s1792_s17 + $0x30] sm:$0xff] }
  0xb1   : > { %v1033_v10 = vpack.c.bf16 %v457_v8, %v453_v7  ;;  %v461_v13 = vld [vmem:[%s1792_s17 + $0x88] sm:$0xff]  ;;  %1030 = vmatprep.subr.bf16.mxu0 %v1029_v5  ;;  %v1035_v15 = vpack.c.bf16 %v456_v12, %v452_v11  ;;  %v460_v16 = vld [vmem:[%s1792_s17 + $0x80] sm:$0xff]  ;;  %v1095_v26 = vpack.c.bf16 %v450_v25, %v446_v24  ;;  %1094 = vmatprep.subr.bf16.mxu1 %v1093_v23  ;;  %v455_v28 = vld [vmem:[%s1792_s17 + $0x58] sm:$0xff] }
  0xb2   : > { %v465_v14 = vld [vmem:[%s1792_s17 + $0xa8] sm:$0xff]  ;;  %1032 = vmatpush1.bf16.msra.mxu0 %v1031_v9  ;;  %v464_v17 = vld [vmem:[%s1792_s17 + $0xa0] sm:$0xff]  ;;  %v459_v29 = vld [vmem:[%s1792_s17 + $0x78] sm:$0xff] }
  0xb3   : > { %1034 = vmatprep.subr.bf16.mxu0 %v1033_v10  ;;  %v1037_v18 = vpack.c.bf16 %v465_v14, %v461_v13  ;;  %v469_v19 = vld [vmem:[%s1792_s17 + $0xc8] sm:$0xff]  ;;  %v1039_v27 = vpack.c.bf16 %v464_v17, %v460_v16  ;;  %v454_v30 = vld [vmem:[%s1792_s17 + $0x50] sm:$0xff]  ;;  %v468_v32 = vld [vmem:[%s1792_s17 + $0xc0] sm:$0xff]  ;;  %1096 = vmatpush1.bf16.msra.mxu1 %v1095_v26  ;;  %v1097_v34 = vpack.c.bf16 %v459_v29, %v455_v28 }
  0xb4   : > { %v473_v22 = vld [vmem:[%s1792_s17 + $0xe8] sm:$0xff]  ;;  %v472_v33 = vld [vmem:[%s1792_s17 + $0xe0] sm:$0xff]  ;;  %v458_v35 = vld [vmem:[%s1792_s17 + $0x70] sm:$0xff] }
  0xb5   : > { %v1041_v31 = vpack.c.bf16 %v473_v22, %v469_v19  ;;  %v477_v36 = vld [vmem:[%s1792_s17 + $0x108] sm:$0xff]  ;;  %v1099_v38 = vpack.c.bf16 %v458_v35, %v454_v30  ;;  %v463_v39 = vld [vmem:[%s1792_s17 + $0x98] sm:$0xff]  ;;  %1098 = vmatprep.subr.bf16.mxu1 %v1097_v34  ;;  %v462_v41 = vld [vmem:[%s1792_s17 + $0x90] sm:$0xff]  ;;  %v1043_v43 = vpack.c.bf16 %v472_v33, %v468_v32 }
  0xb6   : > { %1036 = vmatpush1.bf16.msra.mxu0 %v1035_v15  ;;  %v481_v37 = vld [vmem:[%s1792_s17 + $0x128] sm:$0xff]  ;;  %v467_v40 = vld [vmem:[%s1792_s17 + $0xb8] sm:$0xff]  ;;  %v466_v42 = vld [vmem:[%s1792_s17 + $0xb0] sm:$0xff] }
  0xb7   : > { %1038 = vmatprep.subr.bf16.mxu0 %v1037_v18  ;;  %v476_v44 = vld [vmem:[%s1792_s17 + $0x100] sm:$0xff]  ;;  %v1101_v46 = vpack.c.bf16 %v467_v40, %v463_v39  ;;  %v1045_v47 = vpack.c.bf16 %v481_v37, %v477_v36  ;;  %1100 = vmatpush1.bf16.msra.mxu1 %v1099_v38  ;;  %v485_v48 = vld [vmem:[%s1792_s17 + $0x148] sm:$0xff]  ;;  %v1103_v49 = vpack.c.bf16 %v466_v42, %v462_v41  ;;  %v471_v50 = vld [vmem:[%s1792_s17 + $0xd8] sm:$0xff] }
  0xb8   : > { %v480_v45 = vld [vmem:[%s1792_s17 + $0x120] sm:$0xff]  ;;  %v475_v51 = vld [vmem:[%s1792_s17 + $0xf8] sm:$0xff]  ;;  %v489_v52 = vld [vmem:[%s1792_s17 + $0x168] sm:$0xff] }
  0xb9   : > { %1102 = vmatprep.subr.bf16.mxu1 %v1101_v46  ;;  %v1105_v53 = vpack.c.bf16 %v475_v51, %v471_v50  ;;  %v470_v54 = vld [vmem:[%s1792_s17 + $0xd0] sm:$0xff]  ;;  %v1047_v56 = vpack.c.bf16 %v480_v45, %v476_v44  ;;  %v479_v57 = vld [vmem:[%s1792_s17 + $0x118] sm:$0xff]  ;;  %v1049_v59 = vpack.c.bf16 %v489_v52, %v485_v48  ;;  %v484_v60 = vld [vmem:[%s1792_s17 + $0x140] sm:$0xff] }
  0xba   : > { %1040 = vmatpush1.bf16.msra.mxu0 %v1039_v27  ;;  %v474_v55 = vld [vmem:[%s1792_s17 + $0xf0] sm:$0xff]  ;;  %v483_v58 = vld [vmem:[%s1792_s17 + $0x138] sm:$0xff]  ;;  %v488_v61 = vld [vmem:[%s1792_s17 + $0x160] sm:$0xff] }
  0xbb   : > { %1042 = vmatprep.subr.bf16.mxu0 %v1041_v31  ;;  %1104 = vmatpush1.bf16.msra.mxu1 %v1103_v49  ;;  %v493_v62 = vld [vmem:[%s1792_s17 + $0x188] sm:$0xff]  ;;  %v1107_v63 = vpack.c.bf16 %v474_v55, %v470_v54  ;;  %v1109_v1 = vpack.c.bf16 %v483_v58, %v479_v57  ;;  %v478_v2 = vld [vmem:[%s1792_s17 + $0x110] sm:$0xff]  ;;  %v487_v4 = vld [vmem:[%s1792_s17 + $0x158] sm:$0xff]  ;;  %v1051_v6 = vpack.c.bf16 %v488_v61, %v484_v60 }
  0xbc   : > { %v497_v0 = vld [vmem:[%s1792_s17 + $0x1a8] sm:$0xff]  ;;  %1106 = vmatprep.subr.bf16.mxu1 %v1105_v53  ;;  %v482_v3 = vld [vmem:[%s1792_s17 + $0x130] sm:$0xff]  ;;  %v491_v5 = vld [vmem:[%s1792_s17 + $0x178] sm:$0xff] }
  0xbd   : > { %v1053_v7 = vpack.c.bf16 %v497_v0, %v493_v62  ;;  %v492_v8 = vld [vmem:[%s1792_s17 + $0x180] sm:$0xff]  ;;  %v501_v10 = vld [vmem:[%s1792_s17 + $0x1c8] sm:$0xff]  ;;  %v1111_v11 = vpack.c.bf16 %v482_v3, %v478_v2  ;;  %v1113_v13 = vpack.c.bf16 %v491_v5, %v487_v4  ;;  %v486_v14 = vld [vmem:[%s1792_s17 + $0x150] sm:$0xff] }
  0xbe   : > { %1044 = vmatpush1.bf16.msra.mxu0 %v1043_v43  ;;  %v496_v9 = vld [vmem:[%s1792_s17 + $0x1a0] sm:$0xff]  ;;  %v505_v12 = vld [vmem:[%s1792_s17 + $0x1e8] sm:$0xff]  ;;  %v490_v15 = vld [vmem:[%s1792_s17 + $0x170] sm:$0xff] }
  0xbf   : > { %1046 = vmatprep.subr.bf16.mxu0 %v1045_v47  ;;  %1108 = vmatpush1.bf16.msra.mxu1 %v1107_v63  ;;  %v495_v16 = vld [vmem:[%s1792_s17 + $0x198] sm:$0xff]  ;;  %v1055_v18 = vpack.c.bf16 %v496_v9, %v492_v8  ;;  %v1057_v19 = vpack.c.bf16 %v505_v12, %v501_v10  ;;  %v500_v20 = vld [vmem:[%s1792_s17 + $0x1c0] sm:$0xff]  ;;  %v509_v22 = vld [vmem:[%s1792_s17 + $0x208] sm:$0xff]  ;;  %v1115_v23 = vpack.c.bf16 %v490_v15, %v486_v14 }
  0xc0   : > { %1110 = vmatprep.subr.bf16.mxu1 %v1109_v1  ;;  %v499_v17 = vld [vmem:[%s1792_s17 + $0x1b8] sm:$0xff]  ;;  %v504_v21 = vld [vmem:[%s1792_s17 + $0x1e0] sm:$0xff]  ;;  %v513_v24 = vld [vmem:[%s1792_s17 + $0x228] sm:$0xff] }
  0xc1   : > { %v1117_v25 = vpack.c.bf16 %v499_v17, %v495_v16  ;;  %v494_v26 = vld [vmem:[%s1792_s17 + $0x190] sm:$0xff]  ;;  %v503_v28 = vld [vmem:[%s1792_s17 + $0x1d8] sm:$0xff]  ;;  %v1059_v30 = vpack.c.bf16 %v504_v21, %v500_v20  ;;  %v1061_v31 = vpack.c.bf16 %v513_v24, %v509_v22  ;;  %v508_v32 = vld [vmem:[%s1792_s17 + $0x200] sm:$0xff] }
  0xc2   : > { %1048 = vmatpush1.bf16.msra.mxu0 %v1047_v56  ;;  %v498_v27 = vld [vmem:[%s1792_s17 + $0x1b0] sm:$0xff]  ;;  %v507_v29 = vld [vmem:[%s1792_s17 + $0x1f8] sm:$0xff]  ;;  %v512_v33 = vld [vmem:[%s1792_s17 + $0x220] sm:$0xff] }
  0xc3   : > { %1050 = vmatprep.subr.bf16.mxu0 %v1049_v59  ;;  %1112 = vmatpush1.bf16.msra.mxu1 %v1111_v11  ;;  %v517_v34 = vld [vmem:[%s1792_s17 + $0x248] sm:$0xff]  ;;  %v1119_v35 = vpack.c.bf16 %v498_v27, %v494_v26  ;;  %v1121_v37 = vpack.c.bf16 %v507_v29, %v503_v28  ;;  %v502_v38 = vld [vmem:[%s1792_s17 + $0x1d0] sm:$0xff]  ;;  %v511_v40 = vld [vmem:[%s1792_s17 + $0x218] sm:$0xff]  ;;  %v1063_v42 = vpack.c.bf16 %v512_v33, %v508_v32 }
  0xc4   : > { %1114 = vmatprep.subr.bf16.mxu1 %v1113_v13  ;;  %v521_v36 = vld [vmem:[%s1792_s17 + $0x268] sm:$0xff]  ;;  %v506_v39 = vld [vmem:[%s1792_s17 + $0x1f0] sm:$0xff]  ;;  %v515_v41 = vld [vmem:[%s1792_s17 + $0x238] sm:$0xff] }
  0xc5   : > { %v1065_v43 = vpack.c.bf16 %v521_v36, %v517_v34  ;;  %v516_v44 = vld [vmem:[%s1792_s17 + $0x240] sm:$0xff]  ;;  %v525_v46 = vld [vmem:[%s1792_s17 + $0x288] sm:$0xff]  ;;  %v1123_v47 = vpack.c.bf16 %v506_v39, %v502_v38  ;;  %v1125_v49 = vpack.c.bf16 %v515_v41, %v511_v40  ;;  %v510_v50 = vld [vmem:[%s1792_s17 + $0x210] sm:$0xff] }
  0xc6   : > { %1052 = vmatpush1.bf16.msra.mxu0 %v1051_v6  ;;  %v520_v45 = vld [vmem:[%s1792_s17 + $0x260] sm:$0xff]  ;;  %v529_v48 = vld [vmem:[%s1792_s17 + $0x2a8] sm:$0xff]  ;;  %v514_v51 = vld [vmem:[%s1792_s17 + $0x230] sm:$0xff] }
  0xc7   : > { %1054 = vmatprep.subr.bf16.mxu0 %v1053_v7  ;;  %1116 = vmatpush1.bf16.msra.mxu1 %v1115_v23  ;;  %v519_v52 = vld [vmem:[%s1792_s17 + $0x258] sm:$0xff]  ;;  %v1067_v54 = vpack.c.bf16 %v520_v45, %v516_v44  ;;  %v524_v55 = vld [vmem:[%s1792_s17 + $0x280] sm:$0xff]  ;;  %v1069_v56 = vpack.c.bf16 %v529_v48, %v525_v46  ;;  %v533_v58 = vld [vmem:[%s1792_s17 + $0x2c8] sm:$0xff]  ;;  %v1127_v60 = vpack.c.bf16 %v514_v51, %v510_v50 }
  0xc8   : > { %1118 = vmatprep.subr.bf16.mxu1 %v1117_v25  ;;  %v523_v53 = vld [vmem:[%s1792_s17 + $0x278] sm:$0xff]  ;;  %v528_v57 = vld [vmem:[%s1792_s17 + $0x2a0] sm:$0xff]  ;;  %v537_v59 = vld [vmem:[%s1792_s17 + $0x2e8] sm:$0xff] }
  0xc9   : > { %v1129_v61 = vpack.c.bf16 %v523_v53, %v519_v52  ;;  %v518_v62 = vld [vmem:[%s1792_s17 + $0x250] sm:$0xff]  ;;  %v440_v0 = vld [vmem:[%s342_s14] sm:$0xff]  ;;  %v527_v1 = vld [vmem:[%s1792_s17 + $0x298] sm:$0xff]  ;;  %v1071_v3 = vpack.c.bf16 %v528_v57, %v524_v55  ;;  %v1073_v4 = vpack.c.bf16 %v537_v59, %v533_v58 }
  0xca   : > { %1056 = vmatpush1.bf16.msra.mxu0 %v1055_v18  ;;  %v522_v63 = vld [vmem:[%s1792_s17 + $0x270] sm:$0xff]  ;;  %v531_v2 = vld [vmem:[%s1792_s17 + $0x2b8] sm:$0xff]  ;;  %658 = vmatprep.mubr.f32.mxu0 %v440_v0  ;;  %v532_v5 = vld [vmem:[%s1792_s17 + $0x2c0] sm:$0xff] }
  0xcb   : > { %1058 = vmatprep.subr.bf16.mxu0 %v1057_v19  ;;  %1120 = vmatpush1.bf16.msra.mxu1 %v1119_v35  ;;  %v536_v6 = vld [vmem:[%s1792_s17 + $0x2e0] sm:$0xff]  ;;  %v541_v7 = vld [vmem:[%s1792_s17 + $0x308] sm:$0xff]  ;;  %v1131_v8 = vpack.c.bf16 %v522_v63, %v518_v62  ;;  %v1133_v10 = vpack.c.bf16 %v531_v2, %v527_v1  ;;  %v526_v11 = vld [vmem:[%s1792_s17 + $0x290] sm:$0xff] }
  0xcc   : > { %1122 = vmatprep.subr.bf16.mxu1 %v1121_v37  ;;  %729 = vmatprep.mubr.f32.mxu1 %v440_v0  ;;  %v545_v9 = vld [vmem:[%s1792_s17 + $0x328] sm:$0xff]  ;;  %v530_v12 = vld [vmem:[%s1792_s17 + $0x2b0] sm:$0xff]  ;;  %v535_v13 = vld [vmem:[%s1792_s17 + $0x2d8] sm:$0xff]  ;;  %v1075_v15 = vpack.c.bf16 %v536_v6, %v532_v5 }
  0xcd   : > { %v539_v14 = vld [vmem:[%s1792_s17 + $0x2f8] sm:$0xff]  ;;  %v1077_v16 = vpack.c.bf16 %v545_v9, %v541_v7  ;;  %v540_v17 = vld [vmem:[%s1792_s17 + $0x300] sm:$0xff]  ;;  %v549_v19 = vld [vmem:[%s1792_s17 + $0x348] sm:$0xff]  ;;  %v1135_v20 = vpack.c.bf16 %v530_v12, %v526_v11 }
  0xce   : > { %1060 = vmatpush1.bf16.msra.mxu0 %v1059_v30  ;;  %v544_v18 = vld [vmem:[%s1792_s17 + $0x320] sm:$0xff]  ;;  %v553_v21 = vld [vmem:[%s1792_s17 + $0x368] sm:$0xff]  ;;  %v1137_v22 = vpack.c.bf16 %v539_v14, %v535_v13  ;;  %v534_v23 = vld [vmem:[%s1792_s17 + $0x2d0] sm:$0xff] }
  0xcf   : > { %1062 = vmatprep.subr.bf16.mxu0 %v1061_v31  ;;  %1124 = vmatpush1.bf16.msra.mxu1 %v1123_v47  ;;  %v538_v24 = vld [vmem:[%s1792_s17 + $0x2f0] sm:$0xff]  ;;  %v543_v25 = vld [vmem:[%s1792_s17 + $0x318] sm:$0xff]  ;;  %v1079_v27 = vpack.c.bf16 %v544_v18, %v540_v17  ;;  %v1081_v28 = vpack.c.bf16 %v553_v21, %v549_v19  ;;  %v548_v29 = vld [vmem:[%s1792_s17 + $0x340] sm:$0xff] }
  0xd0   : > { %1126 = vmatprep.subr.bf16.mxu1 %v1125_v49  ;;  %v547_v26 = vld [vmem:[%s1792_s17 + $0x338] sm:$0xff]  ;;  %v552_v30 = vld [vmem:[%s1792_s17 + $0x360] sm:$0xff]  ;;  %v557_v31 = vld [vmem:[%s1792_s17 + $0x388] sm:$0xff]  ;;  %v1139_v32 = vpack.c.bf16 %v538_v24, %v534_v23 }
  0xd1   : > { %v561_v33 = vld [vmem:[%s1792_s17 + $0x3a8] sm:$0xff]  ;;  %v1141_v34 = vpack.c.bf16 %v547_v26, %v543_v25  ;;  %v542_v35 = vld [vmem:[%s1792_s17 + $0x310] sm:$0xff]  ;;  %v551_v37 = vld [vmem:[%s1792_s17 + $0x358] sm:$0xff]  ;;  %v1083_v39 = vpack.c.bf16 %v552_v30, %v548_v29 }
  0xd2   : > { %1064 = vmatpush1.bf16.msra.mxu0 %v1063_v42  ;;  %v546_v36 = vld [vmem:[%s1792_s17 + $0x330] sm:$0xff]  ;;  %v555_v38 = vld [vmem:[%s1792_s17 + $0x378] sm:$0xff]  ;;  %v1085_v40 = vpack.c.bf16 %v561_v33, %v557_v31  ;;  %v556_v41 = vld [vmem:[%s1792_s17 + $0x380] sm:$0xff] }
  0xd3   : > { %1066 = vmatprep.subr.bf16.mxu0 %v1065_v43  ;;  %1128 = vmatpush1.bf16.msra.mxu1 %v1127_v60  ;;  %v560_v42 = vld [vmem:[%s1792_s17 + $0x3a0] sm:$0xff]  ;;  %v565_v43 = vld [vmem:[%s1792_s17 + $0x3c8] sm:$0xff]  ;;  %v1143_v44 = vpack.c.bf16 %v546_v36, %v542_v35  ;;  %v1145_v46 = vpack.c.bf16 %v555_v38, %v551_v37  ;;  %v550_v47 = vld [vmem:[%s1792_s17 + $0x350] sm:$0xff] }
  0xd4   : > { %1130 = vmatprep.subr.bf16.mxu1 %v1129_v61  ;;  %v569_v45 = vld [vmem:[%s1792_s17 + $0x3e8] sm:$0xff]  ;;  %v554_v48 = vld [vmem:[%s1792_s17 + $0x370] sm:$0xff]  ;;  %v559_v49 = vld [vmem:[%s1792_s17 + $0x398] sm:$0xff]  ;;  %v1087_v51 = vpack.c.bf16 %v560_v42, %v556_v41 }
  0xd5   : > { %v563_v50 = vld [vmem:[%s1792_s17 + $0x3b8] sm:$0xff]  ;;  %v1089_v52 = vpack.c.bf16 %v569_v45, %v565_v43  ;;  %v564_v53 = vld [vmem:[%s1792_s17 + $0x3c0] sm:$0xff]  ;;  %v1147_v55 = vpack.c.bf16 %v554_v48, %v550_v47  ;;  %v558_v57 = vld [vmem:[%s1792_s17 + $0x390] sm:$0xff] }
  0xd6   : > { %1068 = vmatpush1.bf16.msra.mxu0 %v1067_v54  ;;  %v568_v54 = vld [vmem:[%s1792_s17 + $0x3e0] sm:$0xff]  ;;  %v562_v58 = vld [vmem:[%s1792_s17 + $0x3b0] sm:$0xff]  ;;  %v567_v59 = vld [vmem:[%s1792_s17 + $0x3d8] sm:$0xff] }
  0xd7   : > { %1070 = vmatprep.subr.bf16.mxu0 %v1069_v56  ;;  %1132 = vmatpush1.bf16.msra.mxu1 %v1131_v8  ;;  %v1149_v56 = vpack.c.bf16 %v563_v50, %v559_v49  ;;  %v571_v60 = vld [vmem:[%s1792_s17 + $0x3f8] sm:$0xff]  ;;  %v1091_v61 = vpack.c.bf16 %v568_v54, %v564_v53  ;;  %v1151_v62 = vpack.c.bf16 %v562_v58, %v558_v57  ;;  %v566_v0 = vld [vmem:[%s1792_s17 + $0x3d0] sm:$0xff]  ;;  %v442_v2 = vld [vmem:[#allocation2] sm:$0xff] }
  0xd8   : > { %1134 = vmatprep.subr.bf16.mxu1 %v1133_v10  ;;  %v1153_v63 = vpack.c.bf16 %v571_v60, %v567_v59  ;;  %v570_v1 = vld [vmem:[%s1792_s17 + $0x3f0] sm:$0xff]  ;;  %v572_v7 = vld [vmem:[%s1804_s30] sm:$0xf] }
  0xda   : > { %1072 = vmatpush1.bf16.msra.mxu0 %v1071_v3  ;;  %v1155_v3 = vpack.c.bf16 %v570_v1, %v566_v0 }
  0xdb   : > { %1074 = vmatprep.subr.bf16.mxu0 %v1073_v4  ;;  %1136 = vmatpush1.bf16.msra.mxu1 %v1135_v20  ;;  %v574_v4 = vlaneseq }
  0xdc   : > { %1138 = vmatprep.subr.bf16.mxu1 %v1137_v22 }
  0xdd   : > { %v575_v5 = vshrl.u32 %v574_v4, 7 }
  0xde   : > { %1076 = vmatpush1.bf16.msra.mxu0 %v1075_v15 }
  0xdf   : > { %1078 = vmatprep.subr.bf16.mxu0 %v1077_v16  ;;  %1140 = vmatpush1.bf16.msra.mxu1 %v1139_v32  ;;  %v576_v6 = vsub.s32 0, %v575_v5  ;;  %v580_v8 = vsub.s32 1, %v575_v5  ;;  %v588_v11 = vsub.s32 3, %v575_v5  ;;  %v584_v19 = vsub.s32 2, %v575_v5  ;;  %v755_v32 = vld [vmem:[%s351_s20] sm:$0xff] }
  0xe0   : > { %1142 = vmatprep.subr.bf16.mxu1 %v1141_v34 }
  0xe1   : > { %v577_v9 = vrot.slane %v572_v7, %v576_v6  ;;  %v581_v10 = vrot.slane %v572_v7, %v580_v8  ;;  %v589_v17 = vrot.slane %v572_v7, %v588_v11  ;;  %v585_v23 = vrot.slane %v572_v7, %v584_v19 }
  0xe2   : > { %1080 = vmatpush1.bf16.msra.mxu0 %v1079_v27 }
  0xe3   : > { %1082 = vmatprep.subr.bf16.mxu0 %v1081_v28  ;;  %1144 = vmatpush1.bf16.msra.mxu1 %v1143_v44 }
  0xe4   : > { %1146 = vmatprep.subr.bf16.mxu1 %v1145_v46 }
  0xe6   : > { %1084 = vmatpush1.bf16.msra.mxu0 %v1083_v39 }
  0xe7   : > { %1086 = vmatprep.subr.bf16.mxu0 %v1085_v40  ;;  %1148 = vmatpush1.bf16.msra.mxu1 %v1147_v55 }
  0xe8   : > { %1150 = vmatprep.subr.bf16.mxu1 %v1149_v56 }
  0xea   : > { %1088 = vmatpush1.bf16.msra.mxu0 %v1087_v51 }
  0xeb   : > { %1090 = vmatprep.subr.bf16.mxu0 %v1089_v52  ;;  %1152 = vmatpush1.bf16.msra.mxu1 %v1151_v62 }
  0xec   : > { %1154 = vmatprep.subr.bf16.mxu1 %v1153_v63 }
  0xee   : > { %1092 = vmatpush1.bf16.msra.mxu0 %v1091_v61 }
  0xef   : > { %1156 = vmatpush1.bf16.msra.mxu1 %v1155_v3 }
  0xf1   : > { %659 = vmatmul.mubr.f32.vlgmr.msra.gmra.mrb[0].mxu0 %v442_v2 }
  0xf2   : > { %730 = vmatmul.mubr.f32.vlgmr.msra.gmra.mrb[0].mxu1 %v442_v2 }
 0x1c4   : > { %v660_v12 = vpop.f32.mrb[0].mxu0 }
 0x1c5   : > { %v661_v13 = vadd.f32 %v660_v12, %v577_v9  ;;  %v662_v14 = vpop.f32.mrb[1].mxu0  ;;  %v731_v20 = vpop.f32.mrb[0].mxu1 }
 0x1c6   : > { %v663_v15 = vadd.f32 %v662_v14, %v581_v10  ;;  %v733_v21 = vpop.f32.mrb[1].mxu1  ;;  %v732_v25 = vadd.f32 %v731_v20, %v585_v23 }
 0x1c7   : > { %v1016_v16 = vmul.f32 -1.442695, %v661_v13  ;;  %v734_v22 = vadd.f32 %v733_v21, %v589_v17 }
 0x1c8   : > { %v1017_v18 = vmul.f32 -1.442695, %v663_v15 }
 0x1c9   : > { %1247 = vpow2.f32 %v1016_v16  ;;  %v1018_v24 = vmul.f32 -1.442695, %v734_v22 }
 0x1ca   : > { %1249 = vpow2.f32 %v1017_v18 }
 0x1cb   : > { %1251 = vpow2.f32 %v1018_v24 }
 0x1cc   : > { %1253 = vtanh.f32 %v732_v25 }
 0x1d3   : > { %v1248_v26 = vpop.eup %1247 }
 0x1d4   : > { %v1250_v27 = vpop.eup %1249  ;;  %v739_v28 = vadd.f32 1.0, %v1248_v26 }
 0x1d5   : > { %v745_v29 = vadd.f32 1.0, %v1250_v27  ;;  %v1252_v30 = vpop.eup %1251 }
 0x1d6   : > { %1255 = vrcp.f32 %v739_v28  ;;  %v1254_v31 = vpop.eup %1253  ;;  %v752_v34 = vadd.f32 1.0, %v1252_v30 }
 0x1d7   : > { %1257 = vrcp.f32 %v745_v29 }
 0x1d8   : > { %1259 = vrcp.f32 %v752_v34 }
 0x1e0   : > { %v1256_v33 = vpop.eup %1255 }
 0x1e1   : > { %v1258_v35 = vpop.eup %1257  ;;  %v757_v36 = vmul.f32 %v1256_v33, %v1254_v31 }
 0x1e2   : > { %v756_v37 = vmul.f32 %v1258_v35, %v755_v32  ;;  %v1260_v39 = vpop.eup %1259 }
 0x1e4   : > { %v758_v38 = vadd.f32 %v757_v36, %v756_v37 }
 0x1e6   : > { %1261 = vtanh.f32 %v758_v38  ;;  %762 = vst [vmem:[%s411_s18] sm:$0xff] %v758_v38 }
 0x1ed   : > { %767 = sbr.rel (%p1019_p2) target bundleno = 500 (0x1f4), region = 72 }
 0x1f0   : > { %v1262_v40 = vpop.eup %1261 }
 0x1f1   : > { %v760_v41 = vmul.f32 %v1262_v40, %v1260_v39 }
 0x1f3   : > { %761 = vst [vmem:[%s404_s10] sm:$0xff] %v760_v41  ;;  %772 = vst [vmem:[#allocation3] sm:$0xff] (!%p1019_p2), %v760_v41 }
 0x1f4 PF: > { %s1022_s11 = sshll.u32 %s1495_s24, 7  ;;  %s793_s14 = sshll.u32 %s404_s10, 4  ;;  %s794_s14 = int_to_ptr.vmem [resolvable:$true] %s793_s14 }
 0x1f5   : > { %s1955_s7 = scalar_lea.hbm %s2032_s5, %s1022_s11  ;;  %s774_s15 = scalar_lea.sflag [#allocation6], %s1779_s29 }
 0x1f6   : > { %s1381_s20 = scalar_lea.vmem %s794_s14, 128  ;;  %p2072_p8 = scmp.ne.s32.totalorder %s2058_s8, 0 }
 0x1f7   : > { %p1382_p3 = scmp.ne.s32.totalorder %s794_s14, %s1381_s20  ;;  %s1511_s12 = smov [#allocation12]  }
 0x1f8   : > { %s1385_s17 = sshll.u32 %s1511_s12, 4  ;;  %s1386_s17 = int_to_ptr.vmem [resolvable:$false] %s1385_s17 }
 0x1f9   : > { %p1383_p9 = pnand %p1382_p3, %p2072_p8  ;;  %s1387_s23 = scalar_lea.vmem %s1386_s17, 256 }
 0x1fa   : > { %p1388_p13 = scmp.lt.s32.totalorder %s794_s14, %s1386_s17  ;;  %p1389_p7 = scmp.lt.s32.totalorder %s1387_s23, %s1381_s20 }
 0x1fb   : > { %p1384_p6 = pneg %p1383_p9 }
 0x1fc   : > { %p1390_p5 = por %p1389_p7, %p1388_p13 }
 0x1fe   : > { %p1391_p4 = pnand %p1390_p5, %p1384_p6 }
 0x200   : > { %1394 = shalt.err (!%p1391_p4)
}
 0x201   : > { %s1395_s27 = scalar_lea.hbm %s1955_s7, 128  ;;  %s1399_s30 = scalar_lea.hbm %s2032_s5, 256 }
 0x202   : > { %p1396_p12 = scmp.ne.s32.totalorder %s1955_s7, %s1395_s27  ;;  %p1400_p1 = scmp.lt.u32.totalorder %s1955_s7, %s2032_s5 }
 0x203   : > { %p1401_p11 = scmp.lt.u32.totalorder %s1399_s30, %s1395_s27  ;;  %p1403_p3 = scmp.lt.u32.totalorder %s1395_s27, %s1955_s7 }
 0x204   : > { %p1397_p0 = pnand %p1396_p12, %p2072_p8 }
 0x205   : > { %p1402_p2 = por %p1401_p11, %p1400_p1 }
 0x206   : > { %p1398_p10 = pneg %p1397_p0 }
 0x207   : > { %p1404_p9 = por %p1403_p3, %p1402_p2 }
 0x209   : > { %p1405_p6 = pnand %p1404_p9, %p1398_p10 }
 0x20b   : > { %1408 = shalt.err (!%p1405_p6)
}
 0x20c   : > { %1167 = dma.vmem_to_hbm [thread:$0]  (%p2072_p8), %s794_s14, 128, %s1955_s7, %s774_s15  }
 0x20d   : > { %s1982_s20 = scalar_lea.hbm %s2033_s6, %s1022_s11  ;;  %s807_s12 = sshll.u32 %s411_s18, 4  ;;  %s808_s12 = int_to_ptr.vmem [resolvable:$true] %s807_s12 }
 0x20e   : > { %s779_s17 = scalar_lea.sflag [#allocation14], %s1779_s29  ;;  %s1409_s23 = scalar_lea.vmem %s808_s12, 128 }
 0x20f   : > { %p1410_p13 = scmp.ne.s32.totalorder %s808_s12, %s1409_s23  ;;  %s1512_s27 = smov [#allocation13]  }
 0x210   : > { %s1413_s9 = sshll.u32 %s1512_s27, 4  ;;  %s1414_s9 = int_to_ptr.vmem [resolvable:$false] %s1413_s9 }
 0x211   : > { %p1411_p7 = pnand %p1410_p13, %p2072_p8  ;;  %s1415_s26 = scalar_lea.vmem %s1414_s9, 256 }
 0x212   : > { %p1416_p4 = scmp.lt.s32.totalorder %s808_s12, %s1414_s9  ;;  %p1417_p12 = scmp.lt.s32.totalorder %s1415_s26, %s1409_s23 }
 0x213   : > { %p1412_p5 = pneg %p1411_p7 }
 0x214   : > { %p1418_p0 = por %p1417_p12, %p1416_p4 }
 0x216   : > { %p1419_p10 = pnand %p1418_p0, %p1412_p5 }
 0x218   : > { %1422 = shalt.err (!%p1419_p10)
}
 0x219   : > { %s1423_s24 = scalar_lea.hbm %s1982_s20, 128  ;;  %s1427_s18 = scalar_lea.hbm %s2033_s6, 256 }
 0x21a   : > { %p1424_p1 = scmp.ne.s32.totalorder %s1982_s20, %s1423_s24  ;;  %p1428_p3 = scmp.lt.u32.totalorder %s1982_s20, %s2033_s6 }
 0x21b   : > { %p1429_p9 = scmp.lt.u32.totalorder %s1427_s18, %s1423_s24  ;;  %p1431_p13 = scmp.lt.u32.totalorder %s1423_s24, %s1982_s20 }
 0x21c   : > { %p1425_p11 = pnand %p1424_p1, %p2072_p8 }
 0x21d   : > { %p1430_p6 = por %p1429_p9, %p1428_p3 }
 0x21e   : > { %p1426_p2 = pneg %p1425_p11 }
 0x21f   : > { %p1432_p7 = por %p1431_p13, %p1430_p6 }
 0x221   : > { %p1433_p5 = pnand %p1432_p7, %p1426_p2 }
 0x223   : > { %1436 = shalt.err (!%p1433_p5)
}
 0x224   : > { %1168 = dma.vmem_to_hbm [thread:$0]  (%p2072_p8), %s808_s12, 128, %s1982_s20, %s779_s17  }
 0x225 PF: > { %s2073_s14 = sld [smem:[#allocation21_spill]]  ;;  %s819_s15 = sand.u32 1, %s1483_s21  }
 0x226   : > { %p2074_p4 = scmp.ne.s32.totalorder %s2059_s16, 0  ;;  %s820_s30 = scalar_lea.sflag [#allocation6], %s819_s15 }
 0x22b   : > { %p2075_p12 = scmp.ge.s32.totalorder %s2073_s14, 2 }
 0x22d   : > { %p1186_p0 = pnand %p2075_p12, %p2074_p4 }
 0x22f   : > { %1474 = dma.done.wait (!%p1186_p0), %s820_s30, 128  }
 0x230   : > { %1476 = vsyncadd (!%p1186_p0), %s820_s30, 4294967168  ;;  %s829_s10 = scalar_lea.sflag [#allocation14], %s819_s15 }
 0x231   : > { %1478 = dma.done.wait (!%p1186_p0), %s829_s10, 128  }
 0x232   : > { %1480 = vsyncadd (!%p1186_p0), %s829_s10, 4294967168  ;;  %s30_s26 = sadd.s32 1, %s2073_s14   ;;  %s2076_s8 = sld [smem:[#allocation20_spill]] }
 0x233   : > { %p27_p10 = scmp.ge.s32.totalorder %s30_s26, 4   ;;  %s2077_s23 = sld [smem:[#allocation23_spill]] }
 0x234   : > { %s2078_s13 = sld [smem:[#allocation22_spill]]  ;;  %s2079_s21 = smov %s1487_s22 }
 0x235   : > { %s2081_s24 = smov %s1499_s25  ;;  %29 = sbr.rel (!%p27_p10) target bundleno = 13 (0xd), region = 151 }
 0x238   : > { %s2080_s22 = smov %s2076_s8 }
 0x23a   : > { %s2082_s25 = smov %s2078_s13 }
 0x23c   :  { %834 = vsyncpa [#allocation5], 1 }
 0x23d   :  { %836 = vsyncpa [#allocation5 + $0x1], 1 }
 0x23e   :  { %837 = vsyncpa [#allocation8], 1 }
 0x23f   :  { %839 = vsyncpa [#allocation8 + $0x1], 1 }
 0x240   :  { %840 = vsyncpa [#allocation11], 1 }
 0x241   :  { %842 = vsyncpa [#allocation11 + $0x1], 1 }
 0x242   :  { %843 = vsyncpa [#allocation6], 1 }
 0x243   :  { %845 = vsyncpa [#allocation6 + $0x1], 1 }
 0x244   :  { %846 = vsyncpa [#allocation14], 1 }
 0x245   :  { %848 = vsyncpa [#allocation14 + $0x1], 1 }

</bundles_post_ra>
